<compile_context>
chip_gen: v7x
topology: tpu7x:2x2x1
jax: 0.10.0
libtpu: 0.0.40
codegen_flags: <defaults>
</compile_context>

<pallas_src>
import jax
import jax.numpy as jnp
from jax.experimental import pallas as pl
from jax.experimental.pallas import tpu as pltpu

_IN_FEATURES = 6
_GROUP = 64                        # batch elements packed into one kernel row
_ROW = _IN_FEATURES * _GROUP       # 384 lanes per packed row (3 full vregs)
_DEFAULT_TILE_BATCH = 131072       # batch elements per grid step (3 MiB block)
_MIN_PALLAS_BATCH = 512            # below this, plain XLA is strictly faster


def _round_up(n, m):
    return ((n + m - 1) // m) * m


def _linear_kernel(x_ref, w_ref, b_ref, o_ref):
    """o[r, j] = sum_k x[r, 6*j + k] * w[6*j + k, j] + bias.

    x_ref: VMEM (tile_rows, 384) f32  -- 64 batch elems x 6 features per row
    w_ref: VMEM (384, 64)        f32  -- block-diagonal expansion of 6 weights
    b_ref: SMEM (1,)             f32
    o_ref: VMEM (tile_rows, 64)  f32
    """
    acc = jnp.dot(
        x_ref[...], w_ref[...],
        preferred_element_type=jnp.float32,
        precision=jax.lax.Precision.HIGHEST,   # full-f32 MXU passes
    )
    o_ref[...] = acc + b_ref[0]                # bias folded in post-reduce


def _reference(x, w_vec, b_vec):
    """Exact f32 elementwise linear (used for tails, tiny batches, checks)."""
    x = x.astype(jnp.float32)
    return (x * w_vec.reshape(1, _IN_FEATURES)).sum(axis=1, keepdims=True) \
        + b_vec.reshape(1, 1)


def eeg_regression_forward(x, weight, bias, *, tile_batch=_DEFAULT_TILE_BATCH):
    """Forward pass of EEGRegression: y = x @ weight.T + bias.

    Args:
      x:      (batch, 6) float32
      weight: (1, 6)     float32   (PyTorch nn.Linear weight layout)
      bias:   (1,)       float32
    Returns:
      (batch, 1) float32
    """
    batch = x.shape[0]
    x = x.astype(jnp.float32)
    w_vec = weight.reshape(_IN_FEATURES).astype(jnp.float32)
    b_vec = bias.reshape(1).astype(jnp.float32)

    b_main = (batch // _GROUP) * _GROUP
    if b_main < _MIN_PALLAS_BATCH:
        # Tiny batches: pallas_call dispatch overhead dwarfs the work.
        return _reference(x, w_vec, b_vec)

    # (b_main, 6) -> (rows, 384): pure row-major reshape => bitcast, no copy.
    x_main = x if b_main == batch else x[:b_main]
    rows = b_main // _GROUP
    x2 = x_main.reshape(rows, _ROW)

    # Block-diagonal weight: W[6*j + k, j] = w[k].  Tiny (96 KiB), per-call.
    w_mat = jnp.kron(jnp.eye(_GROUP, dtype=jnp.float32),
                     w_vec.reshape(_IN_FEATURES, 1))       # (384, 64)

    # Row-axis tiling.  Cap by tile_batch; force >= 2 grid steps when possible
    # so both v7x TensorCores get work; keep tile a multiple of 8 sublanes.
    tile_rows_cap = max(_round_up(tile_batch, _GROUP) // _GROUP, 8)
    tile_rows = min(tile_rows_cap, max(_round_up(pl.cdiv(rows, 2), 8), 8))
    grid = (pl.cdiv(rows, tile_rows),)

    y2 = pl.pallas_call(
        _linear_kernel,
        out_shape=jax.ShapeDtypeStruct((rows, _GROUP), jnp.float32),
        grid=grid,
        in_specs=[
            pl.BlockSpec((tile_rows, _ROW), lambda i: (i, 0)),    # x tile
            pl.BlockSpec((_ROW, _GROUP), lambda i: (0, 0)),       # W (resident)
            pl.BlockSpec(memory_space=pltpu.MemorySpace.SMEM),    # bias scalar
        ],
        out_specs=pl.BlockSpec((tile_rows, _GROUP), lambda i: (i, 0)),
        compiler_params=pltpu.CompilerParams(
            dimension_semantics=("parallel",),   # shards steps across TCs on v7x
        ),
    )(x2, w_mat, b_vec)

    y_main = y2.reshape(b_main, 1)
    if b_main == batch:
        return y_main
    # TODO(synk): ragged tail (< 64 elements) is handled by exact f32 XLA; the
    # prefix slice above may copy when batch is not a multiple of 64.
    y_tail = _reference(x[b_main:], w_vec, b_vec)
    return jnp.concatenate([y_main, y_tail], axis=0)


def init_params(key):
    """Deterministic init mimicking nn.Linear(6, 1): U(-1/sqrt(6), 1/sqrt(6))."""
    k_w, k_b = jax.random.split(key)
    bound = 1.0 / jnp.sqrt(6.0)
    weight = jax.random.uniform(k_w, (1, _IN_FEATURES), jnp.float32, -bound, bound)
    bias = jax.random.uniform(k_b, (1,), jnp.float32, -bound, bound)
    return weight, bias


if __name__ == "__main__":
    key = jax.random.PRNGKey(0)
    k_x, k_p = jax.random.split(key)
    weight, bias = init_params(k_p)
    w_vec = weight.reshape(_IN_FEATURES)
    b_vec = bias.reshape(1)

    # Small but kernel-exercising shape: 2048 x 6 (~48 KiB).  rows = 32,
    # tile_rows = 16 -> a 2-step "parallel" grid (feeds both TCs on v7x).
    batch = 2048
    x = jax.random.normal(k_x, (batch, _IN_FEATURES), jnp.float32)
    out = jax.block_until_ready(eeg_regression_forward(x, weight, bias))
    ref = _reference(x, w_vec, b_vec)
    assert out.shape == (batch, 1)
    assert jnp.allclose(out, ref, atol=1e-5, rtol=1e-5), \
        float(jnp.max(jnp.abs(out - ref)))

    # Ragged batch: Pallas prefix (1536 -> 24 rows, partial last block) + XLA tail.
    batch2 = 1536 + 37
    x2 = jax.random.normal(jax.random.fold_in(k_x, 1),
                           (batch2, _IN_FEATURES), jnp.float32)
    out2 = jax.block_until_ready(eeg_regression_forward(x2, weight, bias))
    ref2 = _reference(x2, w_vec, b_vec)
    assert out2.shape == (batch2, 1)
    assert jnp.allclose(out2, ref2, atol=1e-5, rtol=1e-5), \
        float(jnp.max(jnp.abs(out2 - ref2)))

    # Tiny batch: pure XLA fallback stays numerically identical.
    out3 = jax.block_until_ready(eeg_regression_forward(x[:5], weight, bias))
    assert jnp.allclose(out3, ref[:5], atol=1e-5, rtol=1e-5)

    print("KERNEL_OK")
</pallas_src>

<mosaic_0001>
module attributes {stable_mosaic.version = 11 : i64} {
  func.func @_linear_kernel(%arg0: i32, %arg1: memref<16x384xf32, #tpu.memory_space<vmem>>, %arg2: memref<384x64xf32, #tpu.memory_space<vmem>>, %arg3: memref<1xf32, #tpu.memory_space<smem>>, %arg4: memref<16x64xf32, #tpu.memory_space<vmem>>) attributes {dimension_semantics = [#tpu.dimension_semantics<parallel>], iteration_bounds = array<i64: 2>, scalar_prefetch = 0 : i64, scratch_operands = 0 : i64, tpu.core_type = #tpu.core_type<tc>, window_params = [{transform_indices = @transform_0, window_bounds = array<i64: 16, 384>}, {pipeline_mode = #tpu.pipeline_mode<synchronous>, transform_indices = @transform_1, window_bounds = array<i64: 384, 64>}, {transform_indices = @transform_2, window_bounds = array<i64: 1>}, {transform_indices = @transform_3, window_bounds = array<i64: 16, 64>}]} {
    %c0 = arith.constant 0 : index
    %c0_0 = arith.constant 0 : index
    %0 = vector.load %arg1[%c0, %c0_0] : memref<16x384xf32, #tpu.memory_space<vmem>>, vector<16x384xf32>
    %c0_1 = arith.constant 0 : index
    %c0_2 = arith.constant 0 : index
    %1 = vector.load %arg2[%c0_1, %c0_2] : memref<384x64xf32, #tpu.memory_space<vmem>>, vector<384x64xf32>
    %cst = arith.constant dense<0.000000e+00> : vector<16x64xf32>
    %2 = tpu.matmul %0, %1, %cst {dimension_numbers = #tpu.dot_dimension_numbers<[1], [0], [0], [1], [0, 0, 1, 1], [], []>, precision = #tpu.contract_precision<fp32>} : vector<16x384xf32>, vector<384x64xf32>, vector<16x64xf32> -> vector<16x64xf32>
    %c0_3 = arith.constant 0 : index
    %3 = memref.load %arg3[%c0_3] : memref<1xf32, #tpu.memory_space<smem>>
    %4 = vector.broadcast %3 : f32 to vector<16x64xf32>
    %5 = arith.addf %2, %4 : vector<16x64xf32>
    %c0_4 = arith.constant 0 : index
    %c0_5 = arith.constant 0 : index
    %6 = vector.load %arg4[%c0_4, %c0_5] : memref<16x64xf32, #tpu.memory_space<vmem>>, vector<16x64xf32>
    tpu.vector_store %arg4[%c0_4, %c0_5], %5 {strides = array<i32>} : memref<16x64xf32, #tpu.memory_space<vmem>>, vector<16x64xf32>,
    return
  }
  func.func @transform_0(%arg0: i32) -> (i32, i32) {
    %c0_i32 = arith.constant 0 : i32
    %c0_i32_0 = arith.constant 0 : i32
    return %arg0, %c0_i32 : i32, i32
  }
  func.func @transform_1(%arg0: i32) -> (i32, i32) {
    %c0_i32 = arith.constant 0 : i32
    %c0_i32_0 = arith.constant 0 : i32
    %c0_i32_1 = arith.constant 0 : i32
    return %c0_i32, %c0_i32_0 : i32, i32
  }
  func.func @transform_2(%arg0: i32) -> i32 {
    %c0_i32 = arith.constant 0 : i32
    %c0_i32_0 = arith.constant 0 : i32
    return %c0_i32 : i32
  }
  func.func @transform_3(%arg0: i32) -> (i32, i32) {
    %c0_i32 = arith.constant 0 : i32
    %c0_i32_0 = arith.constant 0 : i32
    return %arg0, %c0_i32 : i32, i32
  }
}

</mosaic_0001>

<bundles_post_ra>
// kernel: tpu_custom_call.1
= control target key start
LH: loop header
LB: loop body
LE: loop exit
PB: predicated region body
PF: predicated region fallthrough
CT: control target
= control target key end

     0   :  { %s3975_s0 = inlined_call_operand.vmem [shape: f32[32,384], index: 0, kind: input, shape index: {}]   ;;  %s3976_s1 = inlined_call_operand.vmem [shape: f32[384,64], index: 1, kind: input, shape index: {}]   ;;  %s3977_s2 = inlined_call_operand.<no memory space> [shape: f32[1], index: 2, kind: input, shape index: {}]   ;;  %s3978_s3 = inlined_call_operand.hbm [shape: f32[32,64], index: 3, kind: output, shape index: {}]  }
   0x1   :  { %8 = sst [smem:[#allocation2]] %s3977_s2 }
   0x2   :  { %9 = vsyncpa [#allocation4], 0 }
   0x3   :  { %11 = vsyncpa [#allocation4 + $0x1], 0  ;;  %s3000_s14 = smov 0   ;;  %s3002_s15 = smov 0  }
   0x4   :  { %s3004_s16 = smov 0   ;;  %s3006_s17 = smov 0  }
   0x5 LB: > { %s3021_s2 = sadd.s32 4294967295, %s2972_s17   ;;  %s1913_s18 = sadd.s32 4294967294, %s2972_s17   ;;  %s2972_s17 = sphi %s3006_s17, %s4186_s17   ;;  %s2968_s16 = sphi %s3004_s16, %s4185_s16   ;;  %s2964_s15 = sphi %s3002_s15, %s4184_s15   ;;  %s2960_s14 = sphi %s3000_s14, %s4183_s14  }
   0x6   : > { %s3025_s19 = sadd.s32 1, %s2972_s17   ;;  %s92_s20 = sadd.s32 1, %s2968_s16 }
   0x7   : > { %s89_s21 = ssub.s32 %s2972_s17, %s3025_s19  ;;  %p102_p0 = scmp.ne.s32.totalorder %s2968_s16, %s2964_s15 }
   0x8   : > { %p90_p1 = scmp.eq.s32.totalorder %s89_s21, 0  ;;  %p103_p2 = scmp.eq.s32.totalorder %s3021_s2, 1 }
   0x9   : > { %p108_p3 = scmp.ne.s32.totalorder %s2964_s15, %s2960_s14  ;;  %p109_p4 = scmp.eq.s32.totalorder %s1913_s18, 1 }
   0xa   : > { %s3036_s22 = scalar_select %p90_p1, %s2968_s16, %s92_s20  }
   0xb   : > { %p3038_p5 = por %p103_p2, %p102_p0  ;;  %p3042_p6 = por %p109_p4, %p108_p3 }
   0xc   : > { %p1916_p7 = scmp.ge.s32.totalorder %s2972_s17, 1  ;;  %p143_p8 = scmp.lt.s32.totalorder %s2972_s17, 3 }
   0xe   : > { %p144_p9 = pnand %p1916_p7, %p143_p8 }
  0x10   : > { %147 = sbr.rel (%p144_p9) target bundleno = 480 (0x1e0), region = 32 }
  0x17   : > { %v198_v0 = vld [vmem:[%s3976_s1 + $0x80] sm:$0xff]  ;;  %v199_v1 = vld [vmem:[%s3976_s1 + $0x88] sm:$0xff]  ;;  %v200_v7 = vld [vmem:[%s3976_s1 + $0x90] sm:$0xff]  ;;  %s1918_s20 = sshll.u32 %s3021_s2, 1  ;;  %s165_s7 = sand.u32 1, %s2964_s15   ;;  %vm1834_vm0 = vcmask 523264  }
  0x18   : > { %v182_v2 = vld [vmem:[%s3976_s1] sm:$0xff]  ;;  %v281_v3 = vand.u32 4294901760, %v198_v0  ;;  %v284_v4 = vand.u32 4294901760, %v199_v1  ;;  %v183_v5 = vld [vmem:[%s3976_s1 + $0x8] sm:$0xff]  ;;  %v201_v8 = vld [vmem:[%s3976_s1 + $0x98] sm:$0xff]  ;;  %v287_v10 = vand.u32 4294901760, %v200_v7 }
  0x19   : > { %v233_v6 = vand.u32 4294901760, %v182_v2  ;;  %v236_v9 = vand.u32 4294901760, %v183_v5  ;;  %v290_v11 = vand.u32 4294901760, %v201_v8  ;;  %v184_v12 = vld [vmem:[%s3976_s1 + $0x10] sm:$0xff]  ;;  %v185_v13 = vld [vmem:[%s3976_s1 + $0x18] sm:$0xff]  ;;  %v202_v18 = vld [vmem:[%s3976_s1 + $0xa0] sm:$0xff] }
  0x1a   : > { %v3072_v14 = vpack.c.bf16 %v284_v4, %v281_v3  ;;  %v3074_v15 = vsub.f32 %v198_v0, %v281_v3  ;;  %v3076_v16 = vsub.f32 %v199_v1, %v284_v4  ;;  %v239_v17 = vand.u32 4294901760, %v184_v12  ;;  %v203_v19 = vld [vmem:[%s3976_s1 + $0xa8] sm:$0xff]  ;;  %v186_v40 = vld [vmem:[%s3976_s1 + $0x20] sm:$0xff]  ;;  %v204_v46 = vld [vmem:[%s3976_s1 + $0xb0] sm:$0xff]  ;;  %p3215_p10 = scmp.lt.s32.totalorder %s1918_s20, 3  ;;  %s1917_s8 = sshll.u32 %s165_s7, 4 }
  0x1b   : > { %v3084_v20 = vpack.c.bf16 %v236_v9, %v233_v6  ;;  %v3086_v21 = vpack.c.bf16 %v290_v11, %v287_v10  ;;  %v3088_v22 = vsub.f32 %v200_v7, %v287_v10  ;;  %v3090_v23 = vsub.f32 %v201_v8, %v290_v11  ;;  %v187_v41 = vld [vmem:[%s3976_s1 + $0x28] sm:$0xff]  ;;  %v205_v55 = vld [vmem:[%s3976_s1 + $0xb8] sm:$0xff]  ;;  %v188_v60 = vld [vmem:[%s3976_s1 + $0x30] sm:$0xff]  ;;  %s167_s9 = scalar_lea.vmem [#allocation3], %s1917_s8  ;;  %s1925_s11 = sshll.u32 %s3021_s2, 8 }
  0x1c   : > { %4063 = vst [vmem:[#allocation6_spill] sm:$0xff] %v3072_v14  ;;  %2473 = vmatprep.subr.bf16.mxu1 %v3072_v14  ;;  %v474_v24 = vand.u32 4294901760, %v3074_v15  ;;  %v481_v25 = vand.u32 4294901760, %v3076_v16  ;;  %v242_v26 = vand.u32 4294901760, %v185_v13  ;;  %v3095_v27 = vsub.f32 %v184_v12, %v239_v17  ;;  %v206_v10 = vld [vmem:[%s3976_s1 + $0xc0] sm:$0xff]  ;;  %v207_v11 = vld [vmem:[%s3976_s1 + $0xc8] sm:$0xff] }
  0x1d   : > { %4064 = vst [vmem:[#allocation7_spill] sm:$0xff] %v3084_v20  ;;  %4065 = vst [vmem:[#allocation8_spill] sm:$0xff] %v3086_v21  ;;  %2475 = vmatpush3.bf16.msra.mxu1 %v3084_v20  ;;  %v3098_v28 = vsub.f32 %v182_v2, %v233_v6  ;;  %v3100_v29 = vsub.f32 %v183_v5, %v236_v9  ;;  %v293_v30 = vand.u32 4294901760, %v202_v18  ;;  %v296_v31 = vand.u32 4294901760, %v203_v19  ;;  %v189_v5 = vld [vmem:[%s3976_s1 + $0x38] sm:$0xff]  ;;  %s4188_s20 = smov (!%p3215_p10, %s1918_s20), 3 }
  0x1e   : > { %2477 = vmatprep.subr.bf16.mxu1 %v3086_v21  ;;  %v3104_v32 = vsub.f32 %v3074_v15, %v474_v24  ;;  %v3107_v33 = vsub.f32 %v3076_v16, %v481_v25  ;;  %v2600_v34 = vpack.c.bf16 %v481_v25, %v474_v24  ;;  %v3109_v35 = vpack.c.bf16 %v242_v26, %v239_v17  ;;  %s2868_s18 = smul.u32 24, %s4188_s20  ;;  %v213_v42 = vld [vmem:[%s3976_s1 + $0xf8] sm:$0xff]  ;;  %s1851_s10 = sshll.u32 %s167_s9, 4  ;;  %s3927_s10 = int_to_ptr.vmem [resolvable:$true] %s1851_s10 }
  0x1f   : > { %v3111_v36 = vsub.f32 %v185_v13, %v242_v26  ;;  %v362_v37 = vand.u32 4294901760, %v3098_v28  ;;  %v369_v38 = vand.u32 4294901760, %v3100_v29  ;;  %v3115_v39 = vpack.c.bf16 %v296_v31, %v293_v30  ;;  %s3934_s21 = scalar_lea.sflag [#allocation4], %s165_s7  ;;  %s2910_s2 = scalar_lea.vmem %s3927_s10, 256 }
  0x20   : > { %4066 = vst [vmem:[#allocation9_spill] sm:$0xff] %v3109_v35  ;;  %2601 = vmatprep.subr.bf16.mxu0 %v2600_v34  ;;  %v3125_v44 = vsub.f32 %v202_v18, %v293_v30  ;;  %v3127_v45 = vsub.f32 %v203_v19, %v296_v31  ;;  %v3984_v50 = vand.u32 4294901760, %v3088_v22  ;;  %v3983_v51 = vand.u32 4294901760, %v3090_v23  ;;  %s3331_s6 = scalar_lea.vmem %s3975_s0, %s2868_s18  ;;  %s3932_s18 = scalar_lea.hbm %s3978_s3, %s1925_s11 }
  0x21   : > { %4067 = vst [vmem:[#allocation10_spill] sm:$0xff] %v3115_v39  ;;  %2479 = vmatpush3.bf16.msra.mxu1 %v3109_v35  ;;  %v3134_v47 = vsub.f32 %v3098_v28, %v362_v37  ;;  %v3137_v48 = vsub.f32 %v3100_v29, %v369_v38  ;;  %v2602_v49 = vpack.c.bf16 %v369_v38, %v362_v37  ;;  %v245_v52 = vand.u32 4294901760, %v186_v40  ;;  %v190_v38 = vld [vmem:[%s3976_s1 + $0x40] sm:$0xff]  ;;  %p2911_p11 = scmp.ne.s32.totalorder %s3927_s10, %s2910_s2  ;;  %s2974_s25 = smov [#allocation3]  }
  0x22   : > { %2481 = vmatprep.subr.bf16.mxu1 %v3115_v39  ;;  %v248_v53 = vand.u32 4294901760, %v187_v41  ;;  %v376_v54 = vand.u32 4294901760, %v3095_v27  ;;  %v383_v58 = vand.u32 4294901760, %v3111_v36  ;;  %v299_v59 = vand.u32 4294901760, %v204_v46  ;;  %s2914_s20 = sshll.u32 %s2974_s25, 4  ;;  %s2915_s20 = int_to_ptr.vmem [resolvable:$false] %s2914_s20 }
  0x23   : > { %2603 = vmatpush3.bf16.msra.mxu0 %v2602_v49  ;;  %v2604_v61 = vpack.c.bf16 %v3983_v51, %v3984_v50  ;;  %v3158_v63 = vsub.f32 %v186_v40, %v245_v52  ;;  %v302_v4 = vand.u32 4294901760, %v205_v55  ;;  %v3982_v7 = vand.u32 4294901760, %v3125_v44  ;;  %p2912_p12 = pnand %p2911_p11, %p3038_p5  ;;  %s2916_s26 = scalar_lea.vmem %s2915_s20, 512 }
  0x24   : > { %v3156_v62 = vpack.c.bf16 %v248_v53, %v245_v52  ;;  %v3160_v0 = vsub.f32 %v187_v41, %v248_v53  ;;  %v3163_v1 = vsub.f32 %v3095_v27, %v376_v54  ;;  %v3166_v2 = vsub.f32 %v3111_v36, %v383_v58  ;;  %v191_v52 = vld [vmem:[%s3976_s1 + $0x48] sm:$0xff]  ;;  %p2917_p0 = scmp.lt.s32.totalorder %s3927_s10, %s2915_s20  ;;  %p2918_p1 = scmp.lt.s32.totalorder %s2916_s26, %s2910_s2 }
  0x25   : > { %4069 = vst [vmem:[#allocation12_spill] sm:$0xff] %v3158_v63  ;;  %v2606_v3 = vpack.c.bf16 %v383_v58, %v376_v54  ;;  %2605 = vmatprep.subr.bf16.mxu0 %v2604_v61  ;;  %v3172_v6 = vsub.f32 %v204_v46, %v299_v59  ;;  %v3981_v8 = vand.u32 4294901760, %v3127_v45  ;;  %v251_v9 = vand.u32 4294901760, %v188_v60  ;;  %p2913_p13 = pneg %p2912_p12 }
  0x26   : > { %4068 = vst [vmem:[#allocation11_spill] sm:$0xff] %v3156_v62  ;;  %4070 = vst [vmem:[#allocation13_spill] sm:$0xff] %v3160_v0  ;;  %2483 = vmatpush3.bf16.msra.mxu1 %v3156_v62  ;;  %v3184_v17 = vpack.c.bf16 %v302_v4, %v299_v59  ;;  %v3186_v18 = vsub.f32 %v205_v55, %v302_v4  ;;  %v254_v24 = vand.u32 4294901760, %v189_v5  ;;  %v390_v26 = vand.u32 4294901760, %v3158_v63  ;;  %v208_v59 = vld [vmem:[%s3976_s1 + $0xd0] sm:$0xff]  ;;  %p2919_p2 = por %p2918_p1, %p2917_p0 }
  0x27   : > { %4071 = vst [vmem:[#allocation14_spill] sm:$0xff] %v3172_v6  ;;  %2607 = vmatpush3.bf16.msra.mxu0 %v2606_v3  ;;  %v2608_v19 = vpack.c.bf16 %v3981_v8, %v3982_v7  ;;  %v3193_v25 = vsub.f32 %v188_v60, %v251_v9  ;;  %v397_v30 = vand.u32 4294901760, %v3160_v0  ;;  %v305_v31 = vand.u32 4294901760, %v206_v10  ;;  %v209_v60 = vld [vmem:[%s3976_s1 + $0xd8] sm:$0xff]  ;;  %v211_v8 = vld [vmem:[%s3976_s1 + $0xe8] sm:$0xff] }
  0x28   : > { %4072 = vst [vmem:[#allocation15_spill] sm:$0xff] %v3184_v17  ;;  %2485 = vmatprep.subr.bf16.mxu1 %v3184_v17  ;;  %v308_v34 = vand.u32 4294901760, %v207_v11  ;;  %v3980_v37 = vand.u32 4294901760, %v3172_v6  ;;  %v3202_v40 = vpack.c.bf16 %v254_v24, %v251_v9  ;;  %v3204_v41 = vsub.f32 %v189_v5, %v254_v24  ;;  %v210_v9 = vld [vmem:[%s3976_s1 + $0xe0] sm:$0xff]  ;;  %p2920_p3 = pnand %p2919_p2, %p2913_p13 }
  0x29   : > { %2609 = vmatprep.subr.bf16.mxu0 %v2608_v19  ;;  %v3207_v46 = vsub.f32 %v3158_v63, %v390_v26  ;;  %v3979_v49 = vand.u32 4294901760, %v3186_v18  ;;  %v3220_v53 = vsub.f32 %v3160_v0, %v397_v30  ;;  %v2610_v54 = vpack.c.bf16 %v397_v30, %v390_v26 }
  0x2a   : > { %4073 = vst [vmem:[#allocation16_spill] sm:$0xff] %v3202_v40  ;;  %v3222_v55 = vpack.c.bf16 %v308_v34, %v305_v31  ;;  %v3224_v58 = vsub.f32 %v206_v10, %v305_v31  ;;  %2487 = vmatpush3.bf16.msra.mxu1 %v3202_v40  ;;  %v3234_v3 = vsub.f32 %v207_v11, %v308_v34  ;;  %v257_v5 = vand.u32 4294901760, %v190_v38  ;;  %v192_v34 = vld [vmem:[%s3976_s1 + $0x50] sm:$0xff] }
  0x2b   : > { %v2612_v4 = vpack.c.bf16 %v3979_v49, %v3980_v37  ;;  %2611 = vmatpush3.bf16.msra.mxu0 %v2610_v54  ;;  %v260_v10 = vand.u32 4294901760, %v191_v52  ;;  %v404_v19 = vand.u32 4294901760, %v3193_v25  ;;  %v411_v24 = vand.u32 4294901760, %v3204_v41  ;;  %v193_v37 = vld [vmem:[%s3976_s1 + $0x58] sm:$0xff] }
  0x2c   : > { %4075 = vst [vmem:[#allocation17_spill] sm:$0xff] %v3222_v55  ;;  %2489 = vmatprep.subr.bf16.mxu1 %v3222_v55  ;;  %v3244_v26 = vsub.f32 %v190_v38, %v257_v5  ;;  %v311_v11 = vand.u32 4294901760, %v208_v59  ;;  %v314_v30 = vand.u32 4294901760, %v209_v60  ;;  %v3986_v31 = vand.u32 4294901760, %v3224_v58 }
  0x2d   : > { %2613 = vmatprep.subr.bf16.mxu0 %v2612_v4  ;;  %v3256_v54 = vpack.c.bf16 %v260_v10, %v257_v5  ;;  %v3258_v49 = vsub.f32 %v191_v52, %v260_v10  ;;  %v3261_v4 = vsub.f32 %v3193_v25, %v404_v19  ;;  %v3264_v38 = vsub.f32 %v3204_v41, %v411_v24 }
  0x2e   : > { %v2614_v61 = vpack.c.bf16 %v411_v24, %v404_v19  ;;  %v3272_v5 = vpack.c.bf16 %v314_v30, %v311_v11  ;;  %v3274_v52 = vsub.f32 %v208_v59, %v311_v11  ;;  %v3276_v10 = vsub.f32 %v209_v60, %v314_v30 }
  0x2f   : > { %4076 = vst [vmem:[#allocation18_spill] sm:$0xff] %v3256_v54  ;;  %2491 = vmatpush3.bf16.msra.mxu1 %v3256_v54  ;;  %v3985_v12 = vand.u32 4294901760, %v3234_v3  ;;  %v263_v19 = vand.u32 4294901760, %v192_v34  ;;  %v266_v59 = vand.u32 4294901760, %v193_v37  ;;  %v418_v60 = vand.u32 4294901760, %v3244_v26 }
  0x30   : > { %4077 = vst [vmem:[#allocation19_spill] sm:$0xff] %v3272_v5  ;;  %2615 = vmatpush3.bf16.msra.mxu0 %v2614_v61  ;;  %2493 = vmatprep.subr.bf16.mxu1 %v3272_v5  ;;  %v425_v24 = vand.u32 4294901760, %v3258_v49  ;;  %v317_v11 = vand.u32 4294901760, %v210_v9  ;;  %v320_v13 = vand.u32 4294901760, %v211_v8  ;;  %v194_v61 = vld [vmem:[%s3976_s1 + $0x60] sm:$0xff]  ;;  %v4001_v54 = vand.u32 4294901760, %v3276_v10 }
  0x31   : > { %v2616_v30 = vpack.c.bf16 %v3985_v12, %v3986_v31  ;;  %v3293_v7 = vsub.f32 %v192_v34, %v263_v19  ;;  %v3299_v50 = vpack.c.bf16 %v266_v59, %v263_v19  ;;  %v3301_v57 = vsub.f32 %v193_v37, %v266_v59  ;;  %v195_v34 = vld [vmem:[%s3976_s1 + $0x68] sm:$0xff]  ;;  %v212_v12 = vld [vmem:[%s3976_s1 + $0xf0] sm:$0xff] }
  0x32   : > { %v3304_v56 = vsub.f32 %v3244_v26, %v418_v60  ;;  %v3307_v43 = vsub.f32 %v3258_v49, %v425_v24  ;;  %v2618_v31 = vpack.c.bf16 %v425_v24, %v418_v60  ;;  %v3315_v19 = vpack.c.bf16 %v320_v13, %v317_v11 }
  0x33   : > { %4078 = vst [vmem:[#allocation20_spill] sm:$0xff] %v3299_v50  ;;  %4079 = vst [vmem:[#allocation21_spill] sm:$0xff] %v3301_v57  ;;  %2617 = vmatprep.subr.bf16.mxu0 %v2616_v30  ;;  %v3317_v37 = vsub.f32 %v210_v9, %v317_v11  ;;  %v3319_v59 = vsub.f32 %v211_v8, %v320_v13  ;;  %2495 = vmatpush3.bf16.msra.mxu1 %v3299_v50  ;;  %v269_v30 = vand.u32 4294901760, %v194_v61 }
  0x34   : > { %4080 = vst [vmem:[#allocation22_spill] sm:$0xff] %v3315_v19  ;;  %2619 = vmatpush3.bf16.msra.mxu0 %v2618_v31  ;;  %2497 = vmatprep.subr.bf16.mxu1 %v3315_v19  ;;  %v272_v8 = vand.u32 4294901760, %v195_v34  ;;  %v432_v13 = vand.u32 4294901760, %v3293_v7  ;;  %v439_v9 = vand.u32 4294901760, %v3301_v57  ;;  %v323_v60 = vand.u32 4294901760, %v212_v12  ;;  %v196_v31 = vld [vmem:[%s3976_s1 + $0x70] sm:$0xff] }
  0x35   : > { %v4081_v24 = vand.u32 4294901760, %v3274_v52  ;;  %v3340_v5 = vsub.f32 %v194_v61, %v269_v30  ;;  %v326_v51 = vand.u32 4294901760, %v213_v42  ;;  %v197_v61 = vld [vmem:[%s3976_s1 + $0x78] sm:$0xff]  ;;  %v4021_v39 = vand.u32 4294901760, %v3319_v59 }
  0x36   : > { %v3346_v19 = vpack.c.bf16 %v272_v8, %v269_v30  ;;  %v3348_v55 = vsub.f32 %v195_v34, %v272_v8  ;;  %v3351_v40 = vsub.f32 %v3293_v7, %v432_v13  ;;  %v3354_v17 = vsub.f32 %v3301_v57, %v439_v9 }
  0x37   : > { %v2620_v11 = vpack.c.bf16 %v4001_v54, %v4081_v24  ;;  %4082 = vst [vmem:[#allocation23_spill] sm:$0xff] %v3340_v5  ;;  %v177_v24 = vld [vmem:[%s3331_s6 + $0x8] sm:$0xff]  ;;  %v2622_v54 = vpack.c.bf16 %v439_v9, %v432_v13  ;;  %v3360_v50 = vpack.c.bf16 %v326_v51, %v323_v60  ;;  %v3362_v30 = vsub.f32 %v212_v12, %v323_v60 }
  0x38   : > { %4083 = vst [vmem:[#allocation24_spill] sm:$0xff] %v3346_v19  ;;  %4084 = vst [vmem:[#allocation25_spill] sm:$0xff] %v3348_v55  ;;  %v3364_v34 = vsub.f32 %v213_v42, %v326_v51  ;;  %2499 = vmatpush3.bf16.msra.mxu1 %v3346_v19  ;;  %v275_v35 = vand.u32 4294901760, %v196_v31  ;;  %v446_v13 = vand.u32 4294901760, %v3340_v5  ;;  %v453_v12 = vand.u32 4294901760, %v3348_v55  ;;  %v176_v42 = vld [vmem:[%s3331_s6] sm:$0xff] }
  0x39   : > { %2621 = vmatprep.subr.bf16.mxu0 %v2620_v11  ;;  %4085 = vst [vmem:[#allocation26_spill] sm:$0xff] %v3360_v50  ;;  %2501 = vmatprep.subr.bf16.mxu1 %v3360_v50  ;;  %v278_v11 = vand.u32 4294901760, %v197_v61  ;;  %v3373_v9 = vand.u32 4294901760, %v177_v24  ;;  %v4086_v51 = vand.u32 4294901760, %v3317_v37  ;;  %v4088_v8 = vand.u32 4294901760, %v3104_v32 }
  0x3a   : > { %2623 = vmatpush3.bf16.msra.mxu0 %v2622_v54  ;;  %v3380_v62 = vsub.f32 %v196_v31, %v275_v35  ;;  %v4089_v54 = vand.u32 4294901760, %v3107_v33  ;;  %v4020_v19 = vand.u32 4294901760, %v3362_v30  ;;  %v3392_v14 = vsub.f32 %v3340_v5, %v446_v13 }
  0x3b   : > { %v2624_v60 = vpack.c.bf16 %v4021_v39, %v4086_v51  ;;  %v3387_v21 = vpack.c.bf16 %v278_v11, %v275_v35  ;;  %v3389_v20 = vsub.f32 %v197_v61, %v278_v11  ;;  %v3395_v0 = vsub.f32 %v3348_v55, %v453_v12  ;;  %1025 = vmatprep.mubr.f32.mxu0 %v3373_v9  ;;  %v214_v35 = vld [vmem:[%s3976_s1 + $0x100] sm:$0xff] }
  0x3c   : > { %4087 = vst [vmem:[#allocation27_spill] sm:$0xff] %v3380_v62  ;;  %v2504_v50 = vpack.c.bf16 %v4089_v54, %v4088_v8  ;;  %v2626_v31 = vpack.c.bf16 %v453_v12, %v446_v13  ;;  %v3399_v32 = vsub.f32 %v177_v24, %v3373_v9  ;;  %v4019_v33 = vand.u32 4294901760, %v3364_v34 }
  0x3d   : > { %4090 = vst [vmem:[#allocation28_spill] sm:$0xff] %v3387_v21  ;;  %2625 = vmatprep.subr.bf16.mxu0 %v2624_v60  ;;  %v3402_v8 = vand.u32 4294901760, %v176_v42  ;;  %2503 = vmatpush3.bf16.msra.mxu1 %v3387_v21  ;;  %v4092_v51 = vand.u32 4294901760, %v3134_v47  ;;  %v4093_v13 = vand.u32 4294901760, %v3137_v48  ;;  %v460_v12 = vand.u32 4294901760, %v3380_v62  ;;  %v215_v47 = vld [vmem:[%s3976_s1 + $0x108] sm:$0xff] }
  0x3e   : > { %4091 = vst [vmem:[#allocation29_spill] sm:$0xff] %v3399_v32  ;;  %2627 = vmatpush3.bf16.msra.mxu0 %v2626_v31  ;;  %v4029_v60 = vand.u32 4294901760, %v3399_v32  ;;  %2505 = vmatprep.subr.bf16.mxu1 %v2504_v50  ;;  %v2628_v54 = vpack.c.bf16 %v4019_v33, %v4020_v19  ;;  %v467_v11 = vand.u32 4294901760, %v3389_v20  ;;  %v4095_v31 = vand.u32 4294901760, %v3088_v22 }
  0x3f   : > { %v2506_v24 = vpack.c.bf16 %v4093_v13, %v4092_v51  ;;  %v3421_v61 = vsub.f32 %v176_v42, %v3402_v8  ;;  %v3428_v48 = vsub.f32 %v3380_v62, %v460_v12  ;;  %v4096_v51 = vand.u32 4294901760, %v3090_v23 }
  0x40   : > { %v489_v50 = vsub.f32 %v3088_v22, %v4095_v31  ;;  %v1151_v33 = vand.u32 4294901760, %v214_v35  ;;  %v331_v42 = vsub.f32 %v3399_v32, %v4029_v60  ;;  %2629 = vmatprep.subr.bf16.mxu0 %v2628_v54  ;;  %v3441_v39 = vsub.f32 %v3389_v20, %v467_v11  ;;  %v216_v60 = vld [vmem:[%s3976_s1 + $0x110] sm:$0xff] }
  0x41   : > { %4094 = vst [vmem:[#allocation30_spill] sm:$0xff] %v3421_v61  ;;  %v496_v13 = vsub.f32 %v3090_v23, %v4096_v51  ;;  %v4030_v19 = vand.u32 4294901760, %v3421_v61  ;;  %v2630_v21 = vpack.c.bf16 %v467_v11, %v460_v12  ;;  %v1154_v55 = vand.u32 4294901760, %v215_v47  ;;  %v217_v11 = vld [vmem:[%s3976_s1 + $0x118] sm:$0xff] }
  0x42   : > { %v490_v63 = vand.u32 4294901760, %v489_v50  ;;  %v332_v5 = vand.u32 4294901760, %v331_v42  ;;  %v3448_v54 = vsub.f32 %v214_v35, %v1151_v33  ;;  %v4098_v42 = vand.u32 4294901760, %v3163_v1 }
  0x43   : > { %v497_v31 = vand.u32 4294901760, %v496_v13  ;;  %v337_v51 = vsub.f32 %v3421_v61, %v4030_v19  ;;  %2631 = vmatpush3.bf16.msra.mxu0 %v2630_v21  ;;  %v3456_v50 = vpack.c.bf16 %v1154_v55, %v1151_v33  ;;  %v3458_v13 = vsub.f32 %v215_v47, %v1154_v55 }
  0x44   : > { %v4099_v19 = vand.u32 4294901760, %v3166_v2  ;;  %333 = vmatprep.mubr.f32.mxu1 %v332_v5  ;;  %v4035_v57 = vand.u32 4294901760, %v3448_v54  ;;  %v4100_v62 = vand.u32 4294901760, %v3125_v44  ;;  %v4101_v32 = vand.u32 4294901760, %v3127_v45 }
  0x45   : > { %v2508_v12 = vpack.c.bf16 %v497_v31, %v490_v63  ;;  %4097 = vst [vmem:[#allocation31_spill] sm:$0xff] %v3456_v50  ;;  %v338_v35 = vand.u32 4294901760, %v337_v51  ;;  %v4037_v55 = vand.u32 4294901760, %v3458_v13  ;;  %v1157_v1 = vand.u32 4294901760, %v216_v60 }
  0x46   : > { %v2510_v21 = vpack.c.bf16 %v4099_v19, %v4098_v42  ;;  %v503_v61 = vsub.f32 %v3125_v44, %v4100_v62  ;;  %v510_v63 = vsub.f32 %v3127_v45, %v4101_v32  ;;  %1027 = vmatmul.mubr.f32.vlgmr.msra.gmra.mrb[0].mxu0 %v3402_v8  ;;  %v1160_v33 = vand.u32 4294901760, %v217_v11  ;;  %v218_v42 = vld [vmem:[%s3976_s1 + $0x120] sm:$0xff] }
  0x47   : > { %v4102_v2 = vand.u32 4294901760, %v3207_v46  ;;  %v4103_v5 = vand.u32 4294901760, %v3220_v53  ;;  %339 = vmatmul.mubr.f32.vlgmr.msra.gmra.mrb[0].mxu1 %v338_v35  ;;  %v1255_v62 = vsub.f32 %v3448_v54, %v4035_v57  ;;  %v4104_v32 = vand.u32 4294901760, %v3172_v6 }
  0x48   : > { %v504_v47 = vand.u32 4294901760, %v503_v61  ;;  %v511_v31 = vand.u32 4294901760, %v510_v63  ;;  %2507 = vmatpush3.bf16.msra.mxu1 %v2506_v24  ;;  %v1262_v46 = vsub.f32 %v3458_v13, %v4037_v55  ;;  %v3489_v53 = vpack.c.bf16 %v1160_v33, %v1157_v1  ;;  %v219_v61 = vld [vmem:[%s3976_s1 + $0x128] sm:$0xff] }
  0x49   : > { %v2514_v19 = vpack.c.bf16 %v4103_v5, %v4102_v2  ;;  %v517_v51 = vsub.f32 %v3172_v6, %v4104_v32  ;;  %v3491_v35 = vsub.f32 %v216_v60, %v1157_v1  ;;  %v3493_v2 = vsub.f32 %v217_v11, %v1160_v33  ;;  %2509 = vmatprep.subr.bf16.mxu1 %v2508_v12 }
  0x4a   : > { %4105 = vst [vmem:[#allocation32_spill] sm:$0xff] %v3489_v53  ;;  %v1256_v63 = vand.u32 4294901760, %v1255_v62  ;;  %v2512_v5 = vpack.c.bf16 %v511_v31, %v504_v47  ;;  %v4107_v24 = vand.u32 4294901760, %v3186_v18  ;;  %v1263_v50 = vand.u32 4294901760, %v1262_v46 }
  0x4b   : > { %4106 = vst [vmem:[#allocation33_spill] sm:$0xff] %v3493_v2  ;;  %v518_v32 = vand.u32 4294901760, %v517_v51  ;;  %v4041_v55 = vand.u32 4294901760, %v3491_v35  ;;  %v4040_v60 = vand.u32 4294901760, %v3493_v2  ;;  %v1163_v1 = vand.u32 4294901760, %v218_v42 }
  0x4c   : > { %v524_v57 = vsub.f32 %v3186_v18, %v4107_v24  ;;  %v1166_v33 = vand.u32 4294901760, %v219_v61  ;;  %v4108_v53 = vand.u32 4294901760, %v3261_v4  ;;  %v4109_v6 = vand.u32 4294901760, %v3264_v38  ;;  %2511 = vmatpush3.bf16.msra.mxu1 %v2510_v21  ;;  %v221_v4 = vld [vmem:[%s3976_s1 + $0x138] sm:$0xff] }
  0x4d   : > { %v4110_v62 = vand.u32 4294901760, %v3224_v58  ;;  %v2696_v31 = vpack.c.bf16 %v1263_v50, %v1256_v63  ;;  %v1269_v51 = vsub.f32 %v3491_v35, %v4041_v55  ;;  %v3516_v46 = vsub.f32 %v218_v42, %v1163_v1  ;;  %2513 = vmatprep.subr.bf16.mxu1 %v2512_v5 }
  0x4e   : > { %v525_v11 = vand.u32 4294901760, %v524_v57  ;;  %v2518_v12 = vpack.c.bf16 %v4109_v6, %v4108_v53  ;;  %v1276_v57 = vsub.f32 %v3493_v2, %v4040_v60  ;;  %v220_v6 = vld [vmem:[%s3976_s1 + $0x130] sm:$0xff]  ;;  %v3524_v50 = vpack.c.bf16 %v1166_v33, %v1163_v1 }
  0x4f   : > { %v531_v47 = vsub.f32 %v3224_v58, %v4110_v62  ;;  %v3526_v21 = vsub.f32 %v219_v61, %v1166_v33  ;;  %2697 = vmatprep.subr.bf16.mxu0 %v2696_v31  ;;  %v1270_v63 = vand.u32 4294901760, %v1269_v51  ;;  %v4045_v42 = vand.u32 4294901760, %v3516_v46 }
  0x50   : > { %v2516_v38 = vpack.c.bf16 %v525_v11, %v518_v32  ;;  %4111 = vst [vmem:[#allocation34_spill] sm:$0xff] %v3524_v50  ;;  %v1277_v24 = vand.u32 4294901760, %v1276_v57  ;;  %v4112_v62 = vand.u32 4294901760, %v3234_v3  ;;  %2699 = vmatpush3.bf16.msra.mxu0 %v2696_v31  ;;  %v1169_v2 = vand.u32 4294901760, %v220_v6  ;;  %2515 = vmatpush3.bf16.msra.mxu1 %v2514_v19  ;;  %v222_v57 = vld [vmem:[%s3976_s1 + $0x140] sm:$0xff] }
  0x51   : > { %v532_v53 = vand.u32 4294901760, %v531_v47  ;;  %v4044_v55 = vand.u32 4294901760, %v3526_v21  ;;  %v1172_v5 = vand.u32 4294901760, %v221_v4  ;;  %v4113_v32 = vand.u32 4294901760, %v3304_v56 }
  0x52   : > { %v538_v60 = vsub.f32 %v3234_v3, %v4112_v62  ;;  %v4114_v61 = vand.u32 4294901760, %v3307_v43  ;;  %v2700_v11 = vpack.c.bf16 %v1277_v24, %v1270_v63  ;;  %v1283_v33 = vsub.f32 %v3516_v46, %v4045_v42  ;;  %2517 = vmatprep.subr.bf16.mxu1 %v2516_v38 }
  0x53   : > { %v4115_v51 = vand.u32 4294901760, %v3274_v52  ;;  %v1290_v43 = vsub.f32 %v3526_v21, %v4044_v55  ;;  %v3549_v56 = vpack.c.bf16 %v1172_v5, %v1169_v2  ;;  %v3551_v19 = vsub.f32 %v220_v6, %v1169_v2 }
  0x54   : > { %v2522_v1 = vpack.c.bf16 %v4114_v61, %v4113_v32  ;;  %v539_v47 = vand.u32 4294901760, %v538_v60  ;;  %v3553_v63 = vsub.f32 %v221_v4, %v1172_v5  ;;  %v223_v60 = vld [vmem:[%s3976_s1 + $0x148] sm:$0xff]  ;;  %2701 = vmatprep.subr.bf16.mxu0 %v2700_v11  ;;  %v1284_v24 = vand.u32 4294901760, %v1283_v33  ;;  %2519 = vmatpush3.bf16.msra.mxu1 %v2518_v12 }
  0x55   : > { %v545_v31 = vsub.f32 %v3274_v52, %v4115_v51  ;;  %4116 = vst [vmem:[#allocation35_spill] sm:$0xff] %v3549_v56  ;;  %v4117_v38 = vand.u32 4294901760, %v3276_v10  ;;  %2703 = vmatpush3.bf16.msra.mxu0 %v2700_v11  ;;  %v1291_v51 = vand.u32 4294901760, %v1290_v43  ;;  %v4047_v55 = vand.u32 4294901760, %v3551_v19 }
  0x56   : > { %v2520_v62 = vpack.c.bf16 %v539_v47, %v532_v53  ;;  %v4046_v2 = vand.u32 4294901760, %v3553_v63  ;;  %v1175_v6 = vand.u32 4294901760, %v222_v57  ;;  %v1178_v5 = vand.u32 4294901760, %v223_v60 }
  0x57   : > { %v546_v32 = vand.u32 4294901760, %v545_v31  ;;  %v552_v61 = vsub.f32 %v3276_v10, %v4117_v38  ;;  %v4118_v42 = vand.u32 4294901760, %v3351_v40  ;;  %v4119_v53 = vand.u32 4294901760, %v3354_v17  ;;  %v224_v17 = vld [vmem:[%s3976_s1 + $0x150] sm:$0xff]  ;;  %v225_v40 = vld [vmem:[%s3976_s1 + $0x158] sm:$0xff] }
  0x58   : > { %v4120_v47 = vand.u32 4294901760, %v3317_v37  ;;  %v2704_v11 = vpack.c.bf16 %v1291_v51, %v1284_v24  ;;  %2521 = vmatprep.subr.bf16.mxu1 %v2520_v62  ;;  %v1297_v43 = vsub.f32 %v3551_v19, %v4047_v55  ;;  %v1304_v12 = vsub.f32 %v3553_v63, %v4046_v2  ;;  %v180_v51 = vld [vmem:[%s3331_s6 + $0x20] sm:$0xff] }
  0x59   : > { %v553_v4 = vand.u32 4294901760, %v552_v61  ;;  %v2526_v33 = vpack.c.bf16 %v4119_v53, %v4118_v42  ;;  %v3576_v38 = vsub.f32 %v222_v57, %v1175_v6  ;;  %v3584_v24 = vpack.c.bf16 %v1178_v5, %v1175_v6  ;;  %2523 = vmatpush3.bf16.msra.mxu1 %v2522_v1 }
  0x5a   : > { %v559_v31 = vsub.f32 %v3317_v37, %v4120_v47  ;;  %v3586_v62 = vsub.f32 %v223_v60, %v1178_v5  ;;  %2705 = vmatprep.subr.bf16.mxu0 %v2704_v11  ;;  %v1298_v53 = vand.u32 4294901760, %v1297_v43  ;;  %v1305_v57 = vand.u32 4294901760, %v1304_v12 }
  0x5b   : > { %v2524_v42 = vpack.c.bf16 %v553_v4, %v546_v32  ;;  %4121 = vst [vmem:[#allocation36_spill] sm:$0xff] %v3584_v24  ;;  %v4051_v47 = vand.u32 4294901760, %v3576_v38  ;;  %v4122_v2 = vand.u32 4294901760, %v3319_v59  ;;  %2707 = vmatpush3.bf16.msra.mxu0 %v2704_v11  ;;  %v1181_v4 = vand.u32 4294901760, %v224_v17  ;;  %v179_v24 = vld [vmem:[%s3331_s6 + $0x18] sm:$0xff] }
  0x5c   : > { %v560_v61 = vand.u32 4294901760, %v559_v31  ;;  %v4050_v32 = vand.u32 4294901760, %v3586_v62  ;;  %v1184_v6 = vand.u32 4294901760, %v225_v40  ;;  %v4123_v60 = vand.u32 4294901760, %v3392_v14 }
  0x5d   : > { %v566_v55 = vsub.f32 %v3319_v59, %v4122_v2  ;;  %v4124_v5 = vand.u32 4294901760, %v3395_v0  ;;  %v2708_v43 = vpack.c.bf16 %v1305_v57, %v1298_v53  ;;  %2525 = vmatprep.subr.bf16.mxu1 %v2524_v42  ;;  %v1311_v12 = vsub.f32 %v3576_v38, %v4051_v47  ;;  %v226_v42 = vld [vmem:[%s3976_s1 + $0x160] sm:$0xff] }
  0x5e   : > { %v3602_v2 = vand.u32 4294901760, %v180_v51  ;;  %v1318_v1 = vsub.f32 %v3586_v62, %v4050_v32  ;;  %v3607_v11 = vpack.c.bf16 %v1184_v6, %v1181_v4  ;;  %v3609_v14 = vsub.f32 %v224_v17, %v1181_v4  ;;  %2527 = vmatpush3.bf16.msra.mxu1 %v2526_v33 }
  0x5f   : > { %v2530_v31 = vpack.c.bf16 %v4124_v5, %v4123_v60  ;;  %v567_v56 = vand.u32 4294901760, %v566_v55  ;;  %v3611_v0 = vsub.f32 %v225_v40, %v1184_v6  ;;  %2709 = vmatprep.subr.bf16.mxu0 %v2708_v43  ;;  %v1312_v53 = vand.u32 4294901760, %v1311_v12 }
  0x60   : > { %4125 = vst [vmem:[#allocation37_spill] sm:$0xff] %v3607_v11  ;;  %v3617_v55 = vsub.f32 %v180_v51, %v3602_v2  ;;  %v3619_v60 = vand.u32 4294901760, %v179_v24  ;;  %1032 = vmatprep.mubr.f32.mxu0 %v3602_v2  ;;  %2711 = vmatpush3.bf16.msra.mxu0 %v2708_v43  ;;  %v1319_v5 = vand.u32 4294901760, %v1318_v1  ;;  %v4054_v17 = vand.u32 4294901760, %v3609_v14 }
  0x61   : > { %4126 = vst [vmem:[#allocation38_spill] sm:$0xff] %v3611_v0  ;;  %v2528_v57 = vpack.c.bf16 %v567_v56, %v560_v61  ;;  %v4055_v40 = vand.u32 4294901760, %v3611_v0  ;;  %v4128_v4 = vand.u32 4294901760, %v3362_v30  ;;  %v227_v56 = vld [vmem:[%s3976_s1 + $0x168] sm:$0xff]  ;;  %v4129_v33 = vand.u32 4294901760, %v3364_v34 }
  0x62   : > { %4127 = vst [vmem:[#allocation39_spill] sm:$0xff] %v3617_v55  ;;  %v4056_v61 = vand.u32 4294901760, %v3617_v55  ;;  %v3632_v51 = vsub.f32 %v179_v24, %v3619_v60  ;;  %v1187_v12 = vand.u32 4294901760, %v226_v42  ;;  %1034 = vmatmul.mubr.f32.gmra.mrb[2].mxu0 %v3619_v60  ;;  %v2712_v1 = vpack.c.bf16 %v1319_v5, %v1312_v53 }
  0x63   : > { %v573_v6 = vsub.f32 %v3362_v30, %v4128_v4  ;;  %2529 = vmatprep.subr.bf16.mxu1 %v2528_v57  ;;  %v580_v43 = vsub.f32 %v3364_v34, %v4129_v33  ;;  %v1325_v4 = vsub.f32 %v3609_v14, %v4054_v17  ;;  %v1332_v57 = vsub.f32 %v3611_v0, %v4055_v40 }
  0x64   : > { %v346_v24 = vsub.f32 %v3617_v55, %v4056_v61  ;;  %v1190_v11 = vand.u32 4294901760, %v227_v56  ;;  %2713 = vmatprep.subr.bf16.mxu0 %v2712_v1  ;;  %2531 = vmatpush3.bf16.msra.mxu1 %v2530_v31  ;;  %v3648_v50 = vsub.f32 %v226_v42, %v1187_v12  ;;  %v4130_v17 = vand.u32 4294901760, %v3428_v48  ;;  %v228_v61 = vld [vmem:[%s3976_s1 + $0x170] sm:$0xff] }
  0x65   : > { %v574_v32 = vand.u32 4294901760, %v573_v6  ;;  %v581_v33 = vand.u32 4294901760, %v580_v43  ;;  %v1326_v53 = vand.u32 4294901760, %v1325_v4  ;;  %v1333_v5 = vand.u32 4294901760, %v1332_v57  ;;  %v229_v43 = vld [vmem:[%s3976_s1 + $0x178] sm:$0xff]  ;;  %2715 = vmatpush3.bf16.msra.mxu0 %v2712_v1  ;;  %v3666_v48 = vld [vmem:[%s3331_s6 + $0x10] sm:$0xff] }
  0x66   : > { %v4131_v40 = vand.u32 4294901760, %v3441_v39  ;;  %v347_v47 = vand.u32 4294901760, %v346_v24  ;;  %v4132_v4 = vand.u32 4294901760, %v3632_v51  ;;  %v3663_v57 = vpack.c.bf16 %v1190_v11, %v1187_v12 }
  0x67   : > { %v2532_v42 = vpack.c.bf16 %v581_v33, %v574_v32  ;;  %v2716_v39 = vpack.c.bf16 %v1333_v5, %v1326_v53  ;;  %v2536_v55 = vpack.c.bf16 %v3076_v16, %v3074_v15  ;;  %v1193_v24 = vand.u32 4294901760, %v228_v61 }
  0x68   : > { %v2534_v6 = vpack.c.bf16 %v4131_v40, %v4130_v17  ;;  %v352_v31 = vsub.f32 %v3632_v51, %v4132_v4  ;;  %v1338_v17 = vand.u32 4294901760, %v3648_v50  ;;  %v3669_v40 = vsub.f32 %v227_v56, %v1190_v11  ;;  %348 = vmatprep.mubr.f32.mxu1 %v347_v47 }
  0x69   : > { %2533 = vmatprep.subr.bf16.mxu1 %v2532_v42  ;;  %v1196_v0 = vand.u32 4294901760, %v229_v43  ;;  %2717 = vmatprep.subr.bf16.mxu0 %v2716_v39  ;;  %v3678_v33 = vand.u32 4294901760, %v3666_v48  ;;  %v3682_v15 = vsub.f32 %v228_v61, %v1193_v24  ;;  %v2538_v53 = vpack.c.bf16 %v3100_v29, %v3098_v28 }
  0x6a   : > { %v353_v1 = vand.u32 4294901760, %v352_v31  ;;  %v1339_v32 = vsub.f32 %v3648_v50, %v1338_v17  ;;  %v1345_v12 = vand.u32 4294901760, %v3669_v40  ;;  %2535 = vmatpush3.bf16.msra.mxu1 %v2534_v6  ;;  %2719 = vmatpush3.bf16.msra.mxu0 %v2716_v39  ;;  %v2540_v4 = vpack.c.bf16 %v3090_v23, %v3088_v22 }
  0x6b   : > { %v3680_v11 = vpack.c.bf16 %v1196_v0, %v1193_v24  ;;  %v3684_v16 = vsub.f32 %v229_v43, %v1196_v0  ;;  %2537 = vmatprep.subr.bf16.mxu1 %v2536_v55  ;;  %v1352_v5 = vand.u32 4294901760, %v3682_v15  ;;  %2329 = vmatprep.mubr.f32.mxu0 %v3678_v33  ;;  %v2550_v55 = vpack.c.bf16 %v3204_v41, %v3193_v25  ;;  %v4139_v24 = vld [vmem:[#allocation29_spill] sm:$0xff] }
  0x6c   : > { %354 = vmatmul.mubr.f32.gmra.mrb[2].mxu1 %v353_v1  ;;  %v1340_v47 = vand.u32 4294901760, %v1339_v32  ;;  %v1346_v56 = vsub.f32 %v3669_v40, %v1345_v12  ;;  %v2552_v28 = vpack.c.bf16 %v3234_v3, %v3224_v58  ;;  %v2542_v22 = vpack.c.bf16 %v3111_v36, %v3095_v27  ;;  %v4133_v58 = vld [vmem:[#allocation21_spill] sm:$0xff]  ;;  %v4134_v27 = vld [vmem:[#allocation23_spill] sm:$0xff]  ;;  %v4140_v32 = vld [vmem:[#allocation14_spill] sm:$0xff] }
  0x6d   : > { %584 = vmatprep.mubr.f32.mxu1 %v3373_v9  ;;  %v1359_v6 = vand.u32 4294901760, %v3684_v16  ;;  %v1353_v61 = vsub.f32 %v3682_v15, %v1352_v5  ;;  %v2554_v23 = vpack.c.bf16 %v3258_v49, %v3244_v26  ;;  %v2544_v25 = vpack.c.bf16 %v3127_v45, %v3125_v44  ;;  %v4135_v36 = vld [vmem:[#allocation25_spill] sm:$0xff]  ;;  %v3719_v26 = vld [vmem:[%s3331_s6 + $0x28] sm:$0xff]  ;;  %s230_s6 = sld [smem:[#allocation2]] }
  0x6e   : > { %v1347_v0 = vand.u32 4294901760, %v1346_v56  ;;  %v2556_v41 = vpack.c.bf16 %v3276_v10, %v3274_v52  ;;  %v2558_v3 = vpack.c.bf16 %v4133_v58, %v3293_v7  ;;  %v2560_v39 = vpack.c.bf16 %v3319_v59, %v3317_v37  ;;  %v4136_v7 = vld [vmem:[#allocation12_spill] sm:$0xff]  ;;  %v4137_v52 = vld [vmem:[#allocation13_spill] sm:$0xff]  ;;  %v4138_v37 = vld [vmem:[#allocation27_spill] sm:$0xff] }
  0x6f   : > { %v1360_v43 = vsub.f32 %v3684_v16, %v1359_v6  ;;  %v1354_v31 = vand.u32 4294901760, %v1353_v61  ;;  %v2562_v1 = vpack.c.bf16 %v4135_v36, %v4134_v27  ;;  %v2564_v44 = vpack.c.bf16 %v3364_v34, %v3362_v30  ;;  %v4153_v36 = vld [vmem:[#allocation38_spill] sm:$0xff] }
  0x70   : > { %586 = vmatmul.mubr.f32.vlgmr.msra.gmra.mrb[4].mxu1 %v3402_v8  ;;  %v2720_v29 = vpack.c.bf16 %v1347_v0, %v1340_v47  ;;  %v2728_v45 = vpack.c.bf16 %v3458_v13, %v3448_v54  ;;  %v2546_v10 = vpack.c.bf16 %v4137_v52, %v4136_v7  ;;  %v2566_v59 = vpack.c.bf16 %v3389_v20, %v4138_v37 }
  0x71   : > { %2539 = vmatpush3.bf16.msra.mxu1 %v2538_v53  ;;  %591 = vmatprep.mubr.f32.mxu1 %v3602_v2  ;;  %v1361_v42 = vand.u32 4294901760, %v1360_v43  ;;  %v2548_v47 = vpack.c.bf16 %v3186_v18, %v4140_v32  ;;  %v4141_v56 = vand.u32 4294901760, %v3448_v54  ;;  %v4142_v30 = vand.u32 4294901760, %v3458_v13 }
  0x72   : > { %2541 = vmatprep.subr.bf16.mxu1 %v2540_v4  ;;  %2721 = vmatprep.subr.bf16.mxu0 %v2720_v29  ;;  %v4143_v53 = vand.u32 4294901760, %v3491_v35  ;;  %v4144_v4 = vld [vmem:[#allocation33_spill] sm:$0xff]  ;;  %v3745_v20 = vand.u32 4294901760, %v3719_v26  ;;  %v4146_v43 = vand.u32 4294901760, %v3516_v46  ;;  %v4148_v54 = vand.u32 4294901760, %v3551_v19 }
  0x73   : > { %2723 = vmatpush3.bf16.msra.mxu0 %v2720_v29  ;;  %v2724_v49 = vpack.c.bf16 %v1361_v42, %v1354_v31  ;;  %v3736_v34 = vpack.c.bf16 %v4142_v30, %v4141_v56  ;;  %v4145_v0 = vand.u32 4294901760, %v4144_v4  ;;  %v4147_v29 = vand.u32 4294901760, %v3526_v21  ;;  %v4178_v56 = vld [vmem:[#allocation37_spill] sm:$0xff]  ;;  %v4179_v30 = vld [vmem:[#allocation28_spill] sm:$0xff] }
  0x74   : > { %593 = vmatmul.mubr.f32.gmra.mrb[6].mxu1 %v3619_v60  ;;  %v4149_v13 = vand.u32 4294901760, %v3553_v63  ;;  %v4150_v31 = vand.u32 4294901760, %v3576_v38  ;;  %v4151_v42 = vand.u32 4294901760, %v3586_v62  ;;  %v3767_v58 = vsub.f32 %v3666_v48, %v3678_v33 }
  0x75   : > { %2543 = vmatpush3.bf16.msra.mxu1 %v2542_v22  ;;  %728 = vmatprep.mubr.f32.mxu1 %v4139_v24  ;;  %v3742_v61 = vpack.c.bf16 %v4145_v0, %v4143_v53  ;;  %v3751_v18 = vpack.c.bf16 %v4147_v29, %v4146_v43  ;;  %v4152_v27 = vand.u32 4294901760, %v3609_v14  ;;  %v4154_v7 = vand.u32 4294901760, %v4153_v36 }
  0x76   : > { %2725 = vmatprep.subr.bf16.mxu0 %v2724_v49  ;;  %2545 = vmatprep.subr.bf16.mxu1 %v2544_v25  ;;  %v3757_v22 = vpack.c.bf16 %v4149_v13, %v4148_v54  ;;  %v3763_v25 = vpack.c.bf16 %v4151_v42, %v4150_v31  ;;  %v3777_v37 = vpack.c.bf16 %v1345_v12, %v1338_v17  ;;  %v4159_v12 = vld [vmem:[#allocation8_spill] sm:$0xff]  ;;  %v4182_v0 = vand.u32 4294901760, %v3632_v51 }
  0x77   : > { %2727 = vmatpush3.bf16.msra.mxu0 %v2724_v49  ;;  %v3773_v52 = vpack.c.bf16 %v4154_v7, %v4152_v27  ;;  %v3779_v32 = vpack.c.bf16 %v1359_v6, %v1352_v5  ;;  %v2732_v49 = vpack.c.bf16 %v4144_v4, %v3491_v35  ;;  %v2736_v48 = vpack.c.bf16 %v3526_v21, %v3516_v46  ;;  %v4163_v6 = vld [vmem:[#allocation31_spill] sm:$0xff] }
  0x78   : > { %2729 = vmatprep.subr.bf16.mxu0 %v2728_v45  ;;  %v2740_v17 = vpack.c.bf16 %v3553_v63, %v3551_v19  ;;  %v2744_v35 = vpack.c.bf16 %v3586_v62, %v3576_v38  ;;  %v2748_v46 = vpack.c.bf16 %v4153_v36, %v3609_v14  ;;  %v2752_v21 = vpack.c.bf16 %v3669_v40, %v3648_v50  ;;  %v4155_v19 = vld [vmem:[#allocation6_spill] sm:$0xff]  ;;  %v4157_v62 = vld [vmem:[#allocation7_spill] sm:$0xff]  ;;  %v4160_v50 = vld [vmem:[#allocation9_spill] sm:$0xff] }
  0x79   : > { %2547 = vmatpush3.bf16.msra.mxu1 %v2546_v10  ;;  %v4156_v63 = vld [vmem:[#allocation30_spill] sm:$0xff]  ;;  %v2756_v38 = vpack.c.bf16 %v3684_v16, %v3682_v15  ;;  %v4158_v14 = vld [vmem:[#allocation39_spill] sm:$0xff]  ;;  %v4162_v5 = vand.u32 4294901760, %v4139_v24  ;;  %v3809_v15 = vsub.f32 %v3719_v26, %v3745_v20  ;;  %v1233_v16 = vand.u32 4294901760, %v3767_v58  ;;  %v4176_v24 = vld [vmem:[#allocation24_spill] sm:$0xff] }
  0x7a   : > { %2549 = vmatprep.subr.bf16.mxu1 %v2548_v47  ;;  %2330 = vmatmul.mubr.f32.vlgmr.msra.gmra.mrb[4].mxu0 %v3745_v20  ;;  %v4161_v40 = vld [vmem:[#allocation10_spill] sm:$0xff]  ;;  %v4171_v26 = vld [vmem:[#allocation19_spill] sm:$0xff]  ;;  %v4180_v53 = vand.u32 4294901760, %v4156_v63  ;;  %v4181_v4 = vand.u32 4294901760, %v4158_v14 }
  0x7b   : > { %2731 = vmatpush3.bf16.msra.mxu0 %v2728_v45  ;;  %2364 = vmatprep.mubr.f32.mxu0 %v3767_v58  ;;  %v4173_v45 = vld [vmem:[#allocation20_spill] sm:$0xff]  ;;  %v4174_v10 = vld [vmem:[#allocation22_spill] sm:$0xff]  ;;  %v1243_v43 = vand.u32 4294901760, %v3809_v15 }
  0x7c   : > { %2733 = vmatprep.subr.bf16.mxu0 %v2732_v49  ;;  %v4177_v47 = vld [vmem:[#allocation26_spill] sm:$0xff] }
  0x7d   : > { %2551 = vmatpush3.bf16.msra.mxu1 %v2550_v55  ;;  %v4164_v55 = vld [vmem:[#allocation11_spill] sm:$0xff] }
  0x7e   : > { %2553 = vmatprep.subr.bf16.mxu1 %v2552_v28  ;;  %v4165_v28 = vld [vmem:[#allocation15_spill] sm:$0xff] }
  0x7f   : > { %2735 = vmatpush3.bf16.msra.mxu0 %v2732_v49 }
  0x80   : > { %2737 = vmatprep.subr.bf16.mxu0 %v2736_v48 }
  0x81   : > { %2555 = vmatpush3.bf16.msra.mxu1 %v2554_v23  ;;  %v4166_v23 = vld [vmem:[#allocation32_spill] sm:$0xff] }
  0x82   : > { %2557 = vmatprep.subr.bf16.mxu1 %v2556_v41  ;;  %v4167_v41 = vld [vmem:[#allocation16_spill] sm:$0xff] }
  0x83   : > { %2739 = vmatpush3.bf16.msra.mxu0 %v2736_v48 }
  0x84   : > { %2741 = vmatprep.subr.bf16.mxu0 %v2740_v17 }
  0x85   : > { %2559 = vmatpush3.bf16.msra.mxu1 %v2558_v3  ;;  %v4168_v3 = vld [vmem:[#allocation17_spill] sm:$0xff] }
  0x86   : > { %2561 = vmatprep.subr.bf16.mxu1 %v2560_v39  ;;  %v4169_v39 = vld [vmem:[#allocation34_spill] sm:$0xff] }
  0x87   : > { %2743 = vmatpush3.bf16.msra.mxu0 %v2740_v17 }
  0x88   : > { %2745 = vmatprep.subr.bf16.mxu0 %v2744_v35 }
  0x89   : > { %2563 = vmatpush3.bf16.msra.mxu1 %v2562_v1  ;;  %v4170_v1 = vld [vmem:[#allocation18_spill] sm:$0xff] }
  0x8a   : > { %2565 = vmatprep.subr.bf16.mxu1 %v2564_v44  ;;  %v4172_v44 = vld [vmem:[#allocation35_spill] sm:$0xff] }
  0x8b   : > { %2747 = vmatpush3.bf16.msra.mxu0 %v2744_v35 }
  0x8c   : > { %2749 = vmatprep.subr.bf16.mxu0 %v2748_v46 }
  0x8d   : > { %2567 = vmatpush3.bf16.msra.mxu1 %v2566_v59  ;;  %v4175_v59 = vld [vmem:[#allocation36_spill] sm:$0xff] }
  0x8e   : > { %2569 = vmatprep.subr.bf16.mxu1 %v4155_v19 }
  0x8f   : > { %2751 = vmatpush3.bf16.msra.mxu0 %v2748_v46 }
  0x90   : > { %731 = vmatmul.mubr.f32.vlgmr.msra.gmra.mrb[8].mxu1 %v4156_v63  ;;  %2753 = vmatprep.subr.bf16.mxu0 %v2752_v21 }
  0x91   : > { %2571 = vmatpush3.bf16.msra.mxu1 %v4157_v62  ;;  %737 = vmatprep.mubr.f32.mxu1 %v4158_v14 }
  0x92   : > { %2573 = vmatprep.subr.bf16.mxu1 %v4159_v12 }
  0x93   : > { %2755 = vmatpush3.bf16.msra.mxu0 %v2752_v21 }
  0x94   : > { %740 = vmatmul.mubr.f32.gmra.mrb[10].mxu1 %v3632_v51  ;;  %2757 = vmatprep.subr.bf16.mxu0 %v2756_v38 }
  0x95   : > { %2575 = vmatpush3.bf16.msra.mxu1 %v4160_v50  ;;  %844 = vmatprep.mubr.f32.mxu1 %v4162_v5 }
  0x96   : > { %2577 = vmatprep.subr.bf16.mxu1 %v4161_v40 }
  0x97   : > { %2759 = vmatpush3.bf16.msra.mxu0 %v2756_v38 }
  0x98   : > { %2761 = vmatprep.subr.bf16.mxu0 %v4163_v6 }
  0x99   : > { %2579 = vmatpush3.bf16.msra.mxu1 %v4164_v55 }
  0x9a   : > { %2581 = vmatprep.subr.bf16.mxu1 %v4165_v28  ;;  %2365 = vmatmul.mubr.f32.vlgmr.msra.gmra.mrb[4].mxu0 %v3809_v15 }
  0x9b   : > { %2763 = vmatpush3.bf16.msra.mxu0 %v4163_v6  ;;  %2399 = vmatprep.mubr.f32.mxu0 %v1233_v16 }
  0x9c   : > { %2765 = vmatprep.subr.bf16.mxu0 %v4166_v23 }
  0x9d   : > { %2583 = vmatpush3.bf16.msra.mxu1 %v4167_v41 }
  0x9e   : > { %2585 = vmatprep.subr.bf16.mxu1 %v4168_v3 }
  0x9f   : > { %2767 = vmatpush3.bf16.msra.mxu0 %v4166_v23 }
  0xa0   : > { %2769 = vmatprep.subr.bf16.mxu0 %v4169_v39 }
  0xa1   : > { %2587 = vmatpush3.bf16.msra.mxu1 %v4170_v1 }
  0xa2   : > { %2589 = vmatprep.subr.bf16.mxu1 %v4171_v26 }
  0xa3   : > { %2771 = vmatpush3.bf16.msra.mxu0 %v4169_v39 }
  0xa4   : > { %2773 = vmatprep.subr.bf16.mxu0 %v4172_v44 }
  0xa5   : > { %2591 = vmatpush3.bf16.msra.mxu1 %v4173_v45 }
  0xa6   : > { %2593 = vmatprep.subr.bf16.mxu1 %v4174_v10 }
  0xa7   : > { %2775 = vmatpush3.bf16.msra.mxu0 %v4172_v44 }
  0xa8   : > { %2777 = vmatprep.subr.bf16.mxu0 %v4175_v59 }
  0xa9   : > { %2595 = vmatpush3.bf16.msra.mxu1 %v4176_v24 }
  0xaa   : > { %2597 = vmatprep.subr.bf16.mxu1 %v4177_v47 }
  0xab   : > { %2779 = vmatpush3.bf16.msra.mxu0 %v4175_v59 }
  0xac   : > { %2781 = vmatprep.subr.bf16.mxu0 %v4178_v56 }
  0xad   : > { %2599 = vmatpush3.bf16.msra.mxu1 %v4179_v30 }
  0xae   : > { %2633 = vmatprep.subr.bf16.mxu1 %v4155_v19 }
  0xaf   : > { %2783 = vmatpush3.bf16.msra.mxu0 %v4178_v56 }
  0xb0   : > { %848 = vmatmul.mubr.f32.vlgmr.msra.gmra.mrb[12].mxu1 %v4180_v53  ;;  %2785 = vmatprep.subr.bf16.mxu0 %v3663_v57 }
  0xb1   : > { %2635 = vmatpush3.bf16.msra.mxu1 %v4157_v62  ;;  %855 = vmatprep.mubr.f32.mxu1 %v4181_v4 }
  0xb2   : > { %2637 = vmatprep.subr.bf16.mxu1 %v4159_v12 }
  0xb3   : > { %2787 = vmatpush3.bf16.msra.mxu0 %v3663_v57 }
  0xb4   : > { %859 = vmatmul.mubr.f32.gmra.mrb[14].mxu1 %v4182_v0  ;;  %2789 = vmatprep.subr.bf16.mxu0 %v3680_v11 }
  0xb5   : > { %2639 = vmatpush3.bf16.msra.mxu1 %v4160_v50  ;;  %1136 = vmatprep.mubr.f32.mxu1 %v3373_v9  ;;  %v1234_v9 = vsub.f32 %v3767_v58, %v1233_v16 }
  0xb6   : > { %2641 = vmatprep.subr.bf16.mxu1 %v4161_v40 }
  0xb7   : > { %2791 = vmatpush3.bf16.msra.mxu0 %v3680_v11  ;;  %v1235_v51 = vand.u32 4294901760, %v1234_v9 }
  0xb8   : > { %2793 = vmatprep.subr.bf16.mxu0 %v3736_v34 }
  0xb9   : > { %2643 = vmatpush3.bf16.msra.mxu1 %v4164_v55 }
  0xba   : > { %2645 = vmatprep.subr.bf16.mxu1 %v4165_v28  ;;  %2400 = vmatmul.mubr.f32.vlgmr.msra.gmra.mrb[4].mxu0 %v1243_v43 }
  0xbb   : > { %2795 = vmatpush3.bf16.msra.mxu0 %v3736_v34  ;;  %2434 = vmatprep.mubr.f32.mxu0 %v3678_v33 }
  0xbc   : > { %2797 = vmatprep.subr.bf16.mxu0 %v3742_v61 }
  0xbd   : > { %2647 = vmatpush3.bf16.msra.mxu1 %v4167_v41 }
  0xbe   : > { %2649 = vmatprep.subr.bf16.mxu1 %v4168_v3 }
  0xbf   : > { %2799 = vmatpush3.bf16.msra.mxu0 %v3742_v61 }
  0xc0   : > { %2801 = vmatprep.subr.bf16.mxu0 %v3751_v18 }
  0xc1   : > { %2651 = vmatpush3.bf16.msra.mxu1 %v4170_v1 }
  0xc2   : > { %2653 = vmatprep.subr.bf16.mxu1 %v4171_v26 }
  0xc3   : > { %2803 = vmatpush3.bf16.msra.mxu0 %v3751_v18 }
  0xc4   : > { %2805 = vmatprep.subr.bf16.mxu0 %v3757_v22 }
  0xc5   : > { %2655 = vmatpush3.bf16.msra.mxu1 %v4173_v45 }
  0xc6   : > { %2657 = vmatprep.subr.bf16.mxu1 %v4174_v10 }
  0xc7   : > { %2807 = vmatpush3.bf16.msra.mxu0 %v3757_v22 }
  0xc8   : > { %2809 = vmatprep.subr.bf16.mxu0 %v3763_v25 }
  0xc9   : > { %2659 = vmatpush3.bf16.msra.mxu1 %v4176_v24 }
  0xca   : > { %2661 = vmatprep.subr.bf16.mxu1 %v4177_v47 }
  0xcb   : > { %2811 = vmatpush3.bf16.msra.mxu0 %v3763_v25 }
  0xcc   : > { %2813 = vmatprep.subr.bf16.mxu0 %v3773_v52 }
  0xcd   : > { %2663 = vmatpush3.bf16.msra.mxu1 %v4179_v30 }
  0xce   : > { %2665 = vmatprep.subr.bf16.mxu1 %v4163_v6 }
  0xcf   : > { %2815 = vmatpush3.bf16.msra.mxu0 %v3773_v52 }
  0xd0   : > { %1138 = vmatmul.mubr.f32.vlgmr.msra.gmra.mrb[16].mxu1 %v3402_v8  ;;  %2817 = vmatprep.subr.bf16.mxu0 %v3777_v37  ;;  %v1244_v8 = vsub.f32 %v3809_v15, %v1243_v43 }
  0xd1   : > { %2667 = vmatpush3.bf16.msra.mxu1 %v4163_v6  ;;  %1143 = vmatprep.mubr.f32.mxu1 %v3602_v2 }
  0xd2   : > { %2669 = vmatprep.subr.bf16.mxu1 %v4166_v23  ;;  %v1245_v2 = vand.u32 4294901760, %v1244_v8 }
  0xd3   : > { %2819 = vmatpush3.bf16.msra.mxu0 %v3777_v37 }
  0xd4   : > { %1145 = vmatmul.mubr.f32.gmra.mrb[18].mxu1 %v3619_v60  ;;  %2821 = vmatprep.subr.bf16.mxu0 %v3779_v32 }
  0xd5   : > { %2671 = vmatpush3.bf16.msra.mxu1 %v4166_v23  ;;  %2294 = vmatprep.mubr.f32.mxu1 %v1235_v51 }
  0xd6   : > { %2673 = vmatprep.subr.bf16.mxu1 %v4169_v39 }
  0xd7   : > { %2823 = vmatpush3.bf16.msra.mxu0 %v3779_v32 }
  0xd8   : > { %2825 = vmatprep.subr.bf16.mxu0 %v4163_v6 }
  0xd9   : > { %2675 = vmatpush3.bf16.msra.mxu1 %v4169_v39 }
  0xda   : > { %2677 = vmatprep.subr.bf16.mxu1 %v4172_v44  ;;  %2435 = vmatmul.mubr.f32.vlgmr.msra.gmra.mrb[4].mxu0 %v3745_v20 }
  0xdb   : > { %2827 = vmatpush3.bf16.msra.mxu0 %v4163_v6  ;;  %2469 = vmatprep.mubr.f32.mxu0 %v3678_v33 }
  0xdc   : > { %2829 = vmatprep.subr.bf16.mxu0 %v4166_v23 }
  0xdd   : > { %2679 = vmatpush3.bf16.msra.mxu1 %v4172_v44 }
  0xde   : > { %2681 = vmatprep.subr.bf16.mxu1 %v4175_v59 }
  0xdf   : > { %2831 = vmatpush3.bf16.msra.mxu0 %v4166_v23 }
  0xe0   : > { %2833 = vmatprep.subr.bf16.mxu0 %v4169_v39 }
  0xe1   : > { %2683 = vmatpush3.bf16.msra.mxu1 %v4175_v59 }
  0xe2   : > { %2685 = vmatprep.subr.bf16.mxu1 %v4178_v56 }
  0xe3   : > { %2835 = vmatpush3.bf16.msra.mxu0 %v4169_v39 }
  0xe4   : > { %2837 = vmatprep.subr.bf16.mxu0 %v4172_v44 }
  0xe5   : > { %2687 = vmatpush3.bf16.msra.mxu1 %v4178_v56 }
  0xe6   : > { %2689 = vmatprep.subr.bf16.mxu1 %v3663_v57 }
  0xe7   : > { %2839 = vmatpush3.bf16.msra.mxu0 %v4172_v44 }
  0xe8   : > { %2841 = vmatprep.subr.bf16.mxu0 %v4175_v59 }
  0xe9   : > { %2691 = vmatpush3.bf16.msra.mxu1 %v3663_v57 }
  0xea   : > { %2693 = vmatprep.subr.bf16.mxu1 %v3680_v11 }
  0xeb   : > { %2843 = vmatpush3.bf16.msra.mxu0 %v4175_v59 }
  0xec   : > { %2845 = vmatprep.subr.bf16.mxu0 %v4178_v56 }
  0xed   : > { %2695 = vmatpush3.bf16.msra.mxu1 %v3680_v11 }
  0xef   : > { %2847 = vmatpush3.bf16.msra.mxu0 %v4178_v56 }
  0xf0   : > { %2295 = vmatmul.mubr.f32.vlgmr.msra.gmra.mrb[20].mxu1 %v1245_v2  ;;  %2849 = vmatprep.subr.bf16.mxu0 %v3663_v57 }
  0xf3   : > { %2851 = vmatpush3.bf16.msra.mxu0 %v3663_v57  ;;  %v231_v57 = vstv %s230_s6 }
  0xf4   : > { %2853 = vmatprep.subr.bf16.mxu0 %v3680_v11 }
  0xf7   : > { %2855 = vmatpush3.bf16.msra.mxu0 %v3680_v11 }
  0xfa   : > { %2470 = vmatmul.mubr.f32.vlgmr.msra.gmra.mrb[4].mxu0 %v3745_v20 }
 0x119   : > { %v2110_v60 = vpop.f32.mrb[0].mxu0 }
 0x11a   : > { %v1958_v33 = vpop.f32.mrb[0].mxu1  ;;  %v2111_v34 = vpop.f32.mrb[1].mxu0 }
 0x11b   : > { %v1959_v61 = vpop.f32.mrb[1].mxu1  ;;  %v2112_v29 = vadd.f32 %v2111_v34, %v2110_v60 }
 0x11c   : > { %v1960_v18 = vadd.f32 %v1959_v61, %v1958_v33 }
 0x11e   : > { %v341_v36 = vadd.f32 %v1960_v18, %v231_v57 }
 0x135   : > { %v2113_v54 = vpop.f32.mrb[2].mxu0 }
 0x136   : > { %v2114_v13 = vpop.f32.mrb[3].mxu0 }
 0x137   : > { %v2115_v22 = vadd.f32 %v2114_v13, %v2113_v54 }
 0x13f   : > { %v1961_v31 = vpop.f32.mrb[2].mxu1 }
 0x140   : > { %v1962_v42 = vpop.f32.mrb[3].mxu1 }
 0x141   : > { %v1963_v25 = vadd.f32 %v1962_v42, %v1961_v31 }
 0x143   : > { %v1996_v58 = vpop.f32.mrb[4].mxu1  ;;  %v356_v37 = vadd.f32 %v1963_v25, %v231_v57 }
 0x144   : > { %v1997_v27 = vpop.f32.mrb[5].mxu1 }
 0x145   : > { %v1998_v11 = vadd.f32 %v1997_v27, %v1996_v58 }
 0x147   : > { %v588_v7 = vadd.f32 %v1998_v11, %v341_v36  ;;  %v1999_v20 = vpop.f32.mrb[6].mxu1 }
 0x148   : > { %v2000_v52 = vpop.f32.mrb[7].mxu1 }
 0x149   : > { %v2001_v32 = vadd.f32 %v2000_v52, %v1999_v20 }
 0x14b   : > { %v595_v49 = vadd.f32 %v2001_v32, %v356_v37 }
 0x163   : > { %v2034_v48 = vpop.f32.mrb[8].mxu1 }
 0x164   : > { %v2035_v17 = vpop.f32.mrb[9].mxu1 }
 0x165   : > { %v2036_v35 = vadd.f32 %v2035_v17, %v2034_v48 }
 0x167   : > { %v733_v46 = vadd.f32 %v2036_v35, %v588_v7  ;;  %v2037_v21 = vpop.f32.mrb[10].mxu1 }
 0x168   : > { %v2038_v19 = vpop.f32.mrb[11].mxu1 }
 0x169   : > { %v2039_v63 = vadd.f32 %v2038_v19, %v2037_v21 }
 0x16b   : > { %v742_v38 = vadd.f32 %v2039_v63, %v595_v49 }
 0x183   : > { %v2072_v62 = vpop.f32.mrb[12].mxu1 }
 0x184   : > { %v2073_v14 = vpop.f32.mrb[13].mxu1 }
 0x185   : > { %v2074_v12 = vadd.f32 %v2073_v14, %v2072_v62 }
 0x187   : > { %v850_v50 = vadd.f32 %v2074_v12, %v733_v46  ;;  %v2075_v40 = vpop.f32.mrb[14].mxu1 }
 0x188   : > { %v2076_v5 = vpop.f32.mrb[15].mxu1 }
 0x189   : > { %v2077_v15 = vadd.f32 %v2076_v5, %v2075_v40  ;;  %v1029_v16 = vadd.f32 %v2112_v29, %v850_v50 }
 0x18b   : > { %v861_v6 = vadd.f32 %v2077_v15, %v742_v38 }
 0x18d   : > { %v1036_v55 = vadd.f32 %v2115_v22, %v861_v6 }
 0x1a3   : > { %v2148_v28 = vpop.f32.mrb[16].mxu1 }
 0x1a4   : > { %v2149_v23 = vpop.f32.mrb[17].mxu1 }
 0x1a5   : > { %v2150_v41 = vadd.f32 %v2149_v23, %v2148_v28 }
 0x1a7   : > { %v2151_v3 = vpop.f32.mrb[18].mxu1  ;;  %v1140_v39 = vadd.f32 %v2150_v41, %v1029_v16 }
 0x1a8   : > { %v2152_v1 = vpop.f32.mrb[19].mxu1 }
 0x1a9   : > { %v2153_v26 = vadd.f32 %v2152_v1, %v2151_v3 }
 0x1ab   : > { %v1147_v44 = vadd.f32 %v2153_v26, %v1036_v55 }
 0x1c3   : > { %v2296_v45 = vpop.f32.mrb[20].mxu1 }
 0x1c4   : > { %v1248_v10 = vadd.f32 %v2296_v45, %v1147_v44  ;;  %v1237_v59 = vpop.f32.mrb[21].mxu1 }
 0x1c5   : > { %v1238_v24 = vadd.f32 %v1237_v59, %v1140_v39 }
 0x1cd   : > { %v2471_v47 = vpop.f32.mrb[4].mxu0 }
 0x1ce   : > { %v2857_v56 = vadd.f32 %v2471_v47, %v1248_v10  ;;  %v1824_v30 = vpop.f32.mrb[5].mxu0 }
 0x1cf   : > { %v2859_v53 = vadd.f32 %v1824_v30, %v1238_v24 }
 0x1d0   : > { %1836 = vst.msk [vmem:[%s167_s9 + $0x8] sm:$0xff] %vm1834_vm0, %v2857_v56 }
 0x1d1   : > { %1835 = vst.msk [vmem:[%s167_s9] sm:$0xff] %vm1834_vm0, %v2859_v53 }
 0x1d2   : > { %2923 = shalt.err (!%p2920_p3)
}
 0x1d3   : > { %s2924_s27 = scalar_lea.hbm %s3932_s18, 256  ;;  %s2928_s30 = scalar_lea.hbm %s3978_s3, 512 }
 0x1d4   : > { %p2925_p4 = scmp.ne.s32.totalorder %s3932_s18, %s2924_s27  ;;  %p2929_p9 = scmp.lt.u32.totalorder %s3932_s18, %s3978_s3 }
 0x1d5   : > { %p2930_p10 = scmp.lt.u32.totalorder %s2928_s30, %s2924_s27  ;;  %p2932_p12 = scmp.lt.u32.totalorder %s2924_s27, %s3932_s18 }
 0x1d6   : > { %p2926_p7 = pnand %p2925_p4, %p3038_p5 }
 0x1d7   : > { %p2931_p11 = por %p2930_p10, %p2929_p9 }
 0x1d8   : > { %p2927_p8 = pneg %p2926_p7 }
 0x1d9   : > { %p2933_p13 = por %p2932_p12, %p2931_p11 }
 0x1db   : > { %p2934_p0 = pnand %p2933_p13, %p2927_p8 }
 0x1dd   : > { %2937 = shalt.err (!%p2934_p0)
}
 0x1de   : > { %s2975_s6 = smov 128   ;;  %s2976_s7 = smov 8  }
 0x1df   : > { %2869 = dma.vmem_to_hbm [thread:$0]  (%p3038_p5), %s3927_s10, 256, %s3932_s18, %s3934_s21, %s2975_s6, %s2975_s6, %s2976_s7  }
 0x1e0 PF: > { %p2875_p1 = scmp.ge.s32.totalorder %s2972_s17, 2  ;;  %s1866_s8 = sand.u32 1, %s2960_s14  }
 0x1e1   : > { %s1867_s9 = scalar_lea.sflag [#allocation4], %s1866_s8 }
 0x1e2   : > { %p2872_p2 = pnand %p2875_p1, %p3042_p6 }
 0x1e4   : > { %2955 = dma.done.wait (!%p2872_p2), %s1867_s9, 256  }
 0x1e5   : > { %2957 = vsyncadd (!%p2872_p2), %s1867_s9, 4294967040  ;;  %p14_p3 = scmp.ge.s32.totalorder %s3025_s19, 4   ;;  %s4183_s14 = smov %s2964_s15 }
 0x1e6   : > { %s4184_s15 = smov %s2968_s16  ;;  %s4185_s16 = smov %s3036_s22 }
 0x1e7   : > { %s4186_s17 = smov %s3025_s19  ;;  %16 = sbr.rel (!%p14_p3) target bundleno = 5 (0x5), region = 67 }
 0x1ee   :  { %1872 = vsyncpa [#allocation4], 1 }
 0x1ef   :  { %1874 = vsyncpa [#allocation4 + $0x1], 1 }

</bundles_post_ra>
